<compile_context>
chip_gen: v7x
topology: tpu7x:2x2x1
jax: 0.10.0
libtpu: 0.0.40
codegen_flags: <defaults>
</compile_context>

<pallas_src>
import functools

import jax
import jax.numpy as jnp
from jax import lax
from jax.experimental import pallas as pl
from jax.experimental.pallas import tpu as pltpu


# ---------------------------------------------------------------------------
# Kernel 1: masked sequence pooling  pooled[b,:] = sum_l valid[b,l] * x[b,l,:]
# ---------------------------------------------------------------------------
def _masked_pool_kernel(x_ref, valid_ref, out_ref):
    x = x_ref[...].astype(jnp.float32)          # (TB, L, D)
    v = valid_ref[...]                          # (TB, L, 1), f32 in {0, 1}
    out_ref[...] = jnp.sum(x * v, axis=1)       # (TB, D)


def _pick_batch_tile(b, row_bytes, budget_bytes=4 << 20):
    """Largest TB with TB | b, (TB % 8 == 0 or TB == b), TB*row_bytes <= budget.

    Keeps the double-buffered input block well inside every chip's default
    scoped-VMEM limit (v5e 16 MiB / v6e 32 MiB / v7x 32 MiB)."""
    if b * row_bytes <= budget_bytes:
        return b
    best = 0
    tb = 8
    while tb < b:
        if b % tb == 0 and tb * row_bytes <= budget_bytes:
            best = tb
        tb += 8
    return best if best else b   # fallback: full batch (vmem limit raised below)


def _masked_pool(x, valid):
    b, l, d = x.shape
    itemsize = jnp.dtype(x.dtype).itemsize
    tb = _pick_batch_tile(b, l * d * itemsize)
    block_bytes = tb * (l * d * itemsize + l * 4 + d * 4)
    vmem_limit = int(min(64 << 20, max(16 << 20, 4 * block_bytes)))
    return pl.pallas_call(
        _masked_pool_kernel,
        out_shape=jax.ShapeDtypeStruct((b, d), jnp.float32),
        grid=(b // tb,),
        in_specs=[
            pl.BlockSpec((tb, l, d), lambda i: (i, 0, 0)),   # sequence block
            pl.BlockSpec((tb, l, 1), lambda i: (i, 0, 0)),   # validity mask
        ],
        out_specs=pl.BlockSpec((tb, d), lambda i: (i, 0)),
        compiler_params=pltpu.CompilerParams(
            dimension_semantics=("parallel",),
            vmem_limit_bytes=vmem_limit),
    )(x, valid)


# ---------------------------------------------------------------------------
# Kernel 2: score matmul (+ fused contrastive-loss epilogue)
# ---------------------------------------------------------------------------
def _scores_loss_kernel(imp_ref, sp_ref, out_ref, *, margin, max_violation,
                        compute_loss):
    # scores[i, j] = pooled_im[i, :] . pooled_s[j, :]   (single MXU matmul)
    scores = lax.dot_general(
        imp_ref[...], sp_ref[...],
        dimension_numbers=(((1,), (1,)), ((), ())),
        preferred_element_type=jnp.float32)              # (B_im, B_s)

    if not compute_loss:
        out_ref[...] = scores
        return

    # Contrastive.compute_contrastive_loss (assumes square score matrix)
    b = scores.shape[0]
    r = lax.broadcasted_iota(jnp.int32, (b, b), 0)
    c = lax.broadcasted_iota(jnp.int32, (b, b), 1)
    eye = r == c

    diag = jnp.where(eye, scores, 0.0)
    d1 = jnp.sum(diag, axis=1, keepdims=True)            # diag[i] per row
    d2 = jnp.sum(diag, axis=0, keepdims=True)            # diag[j] per column

    cost_s = jnp.where(eye, 0.0, jnp.maximum(margin + scores - d1, 0.0))
    cost_im = jnp.where(eye, 0.0, jnp.maximum(margin + scores - d2, 0.0))

    if max_violation:
        total = jnp.sum(jnp.max(cost_s, axis=1)) + jnp.sum(jnp.max(cost_im, axis=0))
    else:
        total = jnp.sum(cost_s) + jnp.sum(cost_im)
    out_ref[...] = total.reshape(1, 1)


def _scores_and_loss(pooled_im, pooled_s, *, margin, max_violation,
                     return_similarity_mat):
    b_im, d = pooled_im.shape
    b_s, _ = pooled_s.shape
    if return_similarity_mat:
        out_shape = jax.ShapeDtypeStruct((b_im, b_s), jnp.float32)
        out_spec = pl.BlockSpec((b_im, b_s), lambda i: (0, 0))
    else:
        out_shape = jax.ShapeDtypeStruct((1, 1), jnp.float32)
        out_spec = pl.BlockSpec((1, 1), lambda i: (0, 0))
    kern = functools.partial(_scores_loss_kernel,
                             margin=float(margin),
                             max_violation=bool(max_violation),
                             compute_loss=not return_similarity_mat)
    return pl.pallas_call(
        kern,
        out_shape=out_shape,
        grid=(1,),
        in_specs=[pl.BlockSpec((b_im, d), lambda i: (0, 0)),
                  pl.BlockSpec((b_s, d), lambda i: (0, 0))],
        out_specs=out_spec,
        compiler_params=pltpu.CompilerParams(
            dimension_semantics=("arbitrary",)),
    )(pooled_im, pooled_s)


# ---------------------------------------------------------------------------
# Wrapper: AlignmentContrastiveLoss.forward  (aggregation='sum')
# ---------------------------------------------------------------------------
def alignment_contrastive_loss(im_set, s_seq, im_len, s_len, *, margin=0.0,
                               max_violation=False,
                               return_similarity_mat=False):
    im_set = jnp.asarray(im_set)
    s_seq = jnp.asarray(s_seq)
    b_im, r_full, d = im_set.shape
    b_s, t_full, d2 = s_seq.shape
    assert d == d2, "feature dims must match"

    im_len = jnp.asarray(im_len, jnp.int32)
    s_len = jnp.asarray(s_len, jnp.int32)

    # Validity masks over the ORIGINAL (unsliced) positions: they fold the
    # im_set[:, 1:, :] / s_seq[:, 1:-2, :] slices and the (im_len-1)/(s_len-3)
    # clipping into one tiny (B, L, 1) mask, so the big tensors are never
    # sliced/copied in HBM before the kernels stream them.
    r_idx = jnp.arange(r_full, dtype=jnp.int32)[None, :]
    t_idx = jnp.arange(t_full, dtype=jnp.int32)[None, :]
    im_valid = ((r_idx >= 1) & (r_idx < im_len[:, None])
                ).astype(jnp.float32)[:, :, None]                 # (B_im, R, 1)
    s_valid = ((t_idx >= 1) & (t_idx <= t_full - 3)
               & (t_idx < s_len[:, None] - 2)
               ).astype(jnp.float32)[:, :, None]                  # (B_s, T, 1)

    # 'sum' aggregation is bilinear: pool once, then one (B_im,D)x(D,B_s) matmul.
    pooled_im = _masked_pool(im_set, im_valid)    # (B_im, D) f32
    pooled_s = _masked_pool(s_seq, s_valid)       # (B_s, D)  f32

    if not return_similarity_mat and b_im != b_s:
        raise ValueError("contrastive loss requires a square score matrix "
                         f"(got B_im={b_im}, B_s={b_s})")

    out = _scores_and_loss(pooled_im, pooled_s, margin=margin,
                           max_violation=max_violation,
                           return_similarity_mat=return_similarity_mat)
    if return_similarity_mat:
        return out
    return out[0, 0]


# ---------------------------------------------------------------------------
# Pure-JAX reference (reproduces the PyTorch semantics, aggregation='sum')
# ---------------------------------------------------------------------------
def _reference_scores(im_set, s_seq, im_len, s_len):
    im = im_set[:, 1:, :].astype(jnp.float32)
    s = s_seq[:, 1:-2, :].astype(jnp.float32)
    il = jnp.asarray(im_len, jnp.int32) - 1
    sl = jnp.asarray(s_len, jnp.int32) - 3
    al = jnp.einsum('ird,jtd->ijrt', im, s)
    im_mask = jnp.arange(im.shape[1])[None, :] >= il[:, None]
    s_mask = jnp.arange(s.shape[1])[None, :] >= sl[:, None]
    mask = im_mask[:, None, :, None] | s_mask[None, :, None, :]
    al = jnp.where(mask, 0.0, al)
    return al.sum(axis=(2, 3))


def _reference(im_set, s_seq, im_len, s_len, *, margin=0.0, max_violation=False):
    scores = _reference_scores(im_set, s_seq, im_len, s_len)
    diag = jnp.diag(scores)
    eye = jnp.eye(scores.shape[0], dtype=bool)
    cost_s = jnp.where(eye, 0.0, jnp.maximum(margin + scores - diag[:, None], 0.0))
    cost_im = jnp.where(eye, 0.0, jnp.maximum(margin + scores - diag[None, :], 0.0))
    if max_violation:
        return cost_s.max(axis=1).sum() + cost_im.max(axis=0).sum()
    return cost_s.sum() + cost_im.sum()


if __name__ == "__main__":
    key = jax.random.PRNGKey(0)
    k1, k2 = jax.random.split(key)

    # small, deterministic example inputs
    B, R, T, D = 4, 9, 11, 128
    im_set = jax.random.normal(k1, (B, R, D), dtype=jnp.float32)
    s_seq = jax.random.normal(k2, (B, T, D), dtype=jnp.float32)
    im_len = [8, 7, 6, 9]      # per-image region counts (before the -1 adjust)
    s_len = [11, 10, 9, 8]     # per-sentence token counts (before the -3 adjust)

    # loss path (sum of hinges)
    loss = alignment_contrastive_loss(im_set, s_seq, im_len, s_len,
                                      margin=0.2, max_violation=False)
    loss = jax.block_until_ready(loss)
    ref = _reference(im_set, s_seq, im_len, s_len, margin=0.2, max_violation=False)
    assert jnp.allclose(loss, ref, rtol=1e-4, atol=1e-4), (loss, ref)

    # max-violation path
    loss_mv = alignment_contrastive_loss(im_set, s_seq, im_len, s_len,
                                         margin=0.2, max_violation=True)
    loss_mv = jax.block_until_ready(loss_mv)
    ref_mv = _reference(im_set, s_seq, im_len, s_len, margin=0.2, max_violation=True)
    assert jnp.allclose(loss_mv, ref_mv, rtol=1e-4, atol=1e-4), (loss_mv, ref_mv)

    # similarity-matrix path
    sim = alignment_contrastive_loss(im_set, s_seq, im_len, s_len,
                                     return_similarity_mat=True)
    sim = jax.block_until_ready(sim)
    ref_sim = _reference_scores(im_set, s_seq, im_len, s_len)
    assert jnp.allclose(sim, ref_sim, rtol=1e-4, atol=1e-4)

    print("KERNEL_OK")
</pallas_src>

<mosaic_0001>
module attributes {stable_mosaic.version = 11 : i64} {
  func.func @_masked_pool_kernel(%arg0: i32, %arg1: memref<4x9x128xf32, #tpu.memory_space<vmem>>, %arg2: memref<4x9x1xf32, #tpu.memory_space<vmem>>, %arg3: memref<4x128xf32, #tpu.memory_space<vmem>>) attributes {dimension_semantics = [#tpu.dimension_semantics<parallel>], iteration_bounds = array<i64: 1>, scalar_prefetch = 0 : i64, scratch_operands = 0 : i64, tpu.core_type = #tpu.core_type<tc>, window_params = [{transform_indices = @transform_0, window_bounds = array<i64: 4, 9, 128>}, {transform_indices = @transform_1, window_bounds = array<i64: 4, 9, 1>}, {transform_indices = @transform_2, window_bounds = array<i64: 4, 128>}]} {
    %c0 = arith.constant 0 : index
    %c0_0 = arith.constant 0 : index
    %c0_1 = arith.constant 0 : index
    %0 = vector.load %arg1[%c0, %c0_0, %c0_1] : memref<4x9x128xf32, #tpu.memory_space<vmem>>, vector<4x9x128xf32>
    %c0_2 = arith.constant 0 : index
    %c0_3 = arith.constant 0 : index
    %c0_4 = arith.constant 0 : index
    %1 = vector.load %arg2[%c0_2, %c0_3, %c0_4] : memref<4x9x1xf32, #tpu.memory_space<vmem>>, vector<4x9x1xf32>
    %2 = vector.broadcast %1 : vector<4x9x1xf32> to vector<4x9x128xf32>
    %3 = arith.mulf %0, %2 : vector<4x9x128xf32>
    %cst = arith.constant dense<0.000000e+00> : vector<4x128xf32>
    %4 = vector.multi_reduction <add>, %3, %cst [1] : vector<4x9x128xf32> to vector<4x128xf32>
    %c0_5 = arith.constant 0 : index
    %c0_6 = arith.constant 0 : index
    %5 = vector.load %arg3[%c0_5, %c0_6] : memref<4x128xf32, #tpu.memory_space<vmem>>, vector<4x128xf32>
    tpu.vector_store %arg3[%c0_5, %c0_6], %4 {strides = array<i32>} : memref<4x128xf32, #tpu.memory_space<vmem>>, vector<4x128xf32>,
    return
  }
  func.func @transform_0(%arg0: i32) -> (i32, i32, i32) {
    %c0_i32 = arith.constant 0 : i32
    %c0_i32_0 = arith.constant 0 : i32
    %c0_i32_1 = arith.constant 0 : i32
    return %arg0, %c0_i32, %c0_i32_0 : i32, i32, i32
  }
  func.func @transform_1(%arg0: i32) -> (i32, i32, i32) {
    %c0_i32 = arith.constant 0 : i32
    %c0_i32_0 = arith.constant 0 : i32
    %c0_i32_1 = arith.constant 0 : i32
    return %arg0, %c0_i32, %c0_i32_0 : i32, i32, i32
  }
  func.func @transform_2(%arg0: i32) -> (i32, i32) {
    %c0_i32 = arith.constant 0 : i32
    %c0_i32_0 = arith.constant 0 : i32
    return %arg0, %c0_i32 : i32, i32
  }
}

</mosaic_0001>

<bundles_post_ra>
// kernel: tpu_custom_call.1
= control target key start
LH: loop header
LB: loop body
LE: loop exit
PB: predicated region body
PF: predicated region fallthrough
CT: control target
= control target key end

     0   :  { %v163_v2 = vmov 0   ;;  %s244_s0 = inlined_call_operand.vmem [shape: f32[4,9,128], index: 0, kind: input, shape index: {}]   ;;  %s245_s1 = inlined_call_operand.vmem [shape: f32[4,9,1], index: 1, kind: input, shape index: {}]   ;;  %s246_s2 = inlined_call_operand.hbm [shape: f32[4,128], index: 2, kind: output, shape index: {}]  }
   0x1   :  { %v21_v0 = vld [vmem:[%s245_s1 + $0x8] sm:$0x1]  ;;  %v20_v1 = vld [vmem:[%s245_s1] sm:$0xff]  ;;  %138 = vset.pattern.permute.xlu1 %v163_v2  ;;  %137 = vset.pattern.permute.xlu0 %v163_v2  ;;  %v23_v3 = vld [vmem:[%s245_s1 + $0x18] sm:$0x1] }
   0x2   :  { %35 = vperm.xlu0 %137, %v21_v0   ;;  %30 = vperm.xlu1 %138, %v20_v1   ;;  %v22_v4 = vld [vmem:[%s245_s1 + $0x10] sm:$0xff] }
   0x3   :  { %7 = vsyncpa [#allocation3], 0  ;;  %v25_v5 = vld [vmem:[%s245_s1 + $0x28] sm:$0x1]  ;;  %v24_v6 = vld [vmem:[%s245_s1 + $0x20] sm:$0xff]  ;;  %vm76_vm0 = vcmask 1040384  }
   0x4   :  { %v27_v7 = vld [vmem:[%s245_s1 + $0x38] sm:$0x1]  ;;  %v26_v8 = vld [vmem:[%s245_s1 + $0x30] sm:$0xff]  ;;  %v13_v9 = vld [vmem:[%s244_s0 + $0x8] sm:$0x1]  ;;  %vm113_vm1 = vcmask 1041409  }
   0x5   :  { %v12_v10 = vld [vmem:[%s244_s0] sm:$0xff]  ;;  %v15_v15 = vld [vmem:[%s244_s0 + $0x18] sm:$0x1]  ;;  %v14_v16 = vld [vmem:[%s244_s0 + $0x10] sm:$0xff]  ;;  %vm115_vm2 = vcmask 1042434   ;;  %vm117_vm3 = vcmask 1043459  }
   0x6   :  { %45 = vperm.xlu0 %137, %v23_v3   ;;  %40 = vperm.xlu1 %138, %v22_v4   ;;  %v17_v24 = vld [vmem:[%s244_s0 + $0x28] sm:$0x1]  ;;  %v16_v25 = vld [vmem:[%s244_s0 + $0x20] sm:$0xff]  ;;  %v19_v34 = vld [vmem:[%s244_s0 + $0x38] sm:$0x1] }
   0x7   :  { %v18_v35 = vld [vmem:[%s244_s0 + $0x30] sm:$0xff]  ;;  %s164_s0 = smov [#allocation2]  }
   0x8   :  { %s127_s12 = sshll.u32 %s164_s0, 4  ;;  %s128_s12 = int_to_ptr.vmem [resolvable:$true] %s127_s12 }
   0x9   :  { %s139_s13 = scalar_lea.vmem %s128_s12, 64  ;;  %p144_p1 = scmp.lt.s32.totalorder %s128_s12, %s128_s12 }
   0xa   :  { %55 = vperm.xlu0 %137, %v25_v5   ;;  %50 = vperm.xlu1 %138, %v24_v6   ;;  %p140_p0 = scmp.ne.s32.totalorder %s128_s12, %s139_s13  ;;  %p145_p2 = scmp.lt.s32.totalorder %s139_s13, %s139_s13 }
   0xc   :  { %p146_p3 = por %p145_p2, %p144_p1 }
   0xe   :  { %65 = vperm.xlu0 %137, %v27_v7   ;;  %60 = vperm.xlu1 %138, %v26_v8   ;;  %p147_p4 = pnand %p146_p3, %p140_p0 }
  0x81   :  { %v36_v11 = vpop.permute.xlu0 %35  ;;  %v31_v12 = vpop.permute.xlu1 %30 }
  0x82   :  { %v69_v13 = vmul.f32 %v36_v11, %v13_v9  ;;  %v68_v14 = vmul.f32 %v31_v12, %v12_v10 }
  0x84   :  { %v77_v17 = vsel %vm76_vm0, %v69_v13, 0.0 }
  0x85   :  { %v78_v18 = vadd.f32 %v77_v17, %v68_v14  ;;  %v46_v19 = vpop.permute.xlu0 %45  ;;  %v41_v20 = vpop.permute.xlu1 %40 }
  0x86   :  { %v71_v21 = vmul.f32 %v46_v19, %v15_v15  ;;  %v70_v22 = vmul.f32 %v41_v20, %v14_v16 }
  0x87   :  { %v79_v23 = vrot.slane %v78_v18, 4 }
  0x88   :  { %v85_v26 = vsel %vm76_vm0, %v71_v21, 0.0 }
  0x89   :  { %v86_v27 = vadd.f32 %v85_v26, %v70_v22  ;;  %v56_v28 = vpop.permute.xlu0 %55  ;;  %v51_v29 = vpop.permute.xlu1 %50  ;;  %v80_v32 = vadd.f32 %v79_v23, %v78_v18 }
  0x8a   :  { %v73_v30 = vmul.f32 %v56_v28, %v17_v24  ;;  %v72_v31 = vmul.f32 %v51_v29, %v16_v25 }
  0x8b   :  { %v87_v33 = vrot.slane %v86_v27, 4  ;;  %v81_v43 = vrot.slane %v80_v32, 2 }
  0x8c   :  { %v93_v36 = vsel %vm76_vm0, %v73_v30, 0.0 }
  0x8d   :  { %v88_v37 = vadd.f32 %v87_v33, %v86_v27  ;;  %v94_v38 = vadd.f32 %v93_v36, %v72_v31  ;;  %v66_v39 = vpop.permute.xlu0 %65  ;;  %v61_v40 = vpop.permute.xlu1 %60  ;;  %v82_v50 = vadd.f32 %v81_v43, %v80_v32 }
  0x8e   :  { %v75_v41 = vmul.f32 %v66_v39, %v19_v34  ;;  %v74_v42 = vmul.f32 %v61_v40, %v18_v35 }
  0x8f   :  { %v89_v44 = vrot.slane %v88_v37, 2  ;;  %v95_v45 = vrot.slane %v94_v38, 4  ;;  %v83_v56 = vrot.slane %v82_v50, 1 }
  0x90   :  { %v101_v46 = vsel %vm76_vm0, %v75_v41, 0.0 }
  0x91   :  { %v90_v47 = vadd.f32 %v89_v44, %v88_v37  ;;  %v96_v48 = vadd.f32 %v95_v45, %v94_v38  ;;  %v102_v49 = vadd.f32 %v101_v46, %v74_v42  ;;  %v84_v62 = vadd.f32 %v83_v56, %v82_v50 }
  0x93   :  { %v97_v51 = vrot.slane %v96_v48, 2  ;;  %v103_v52 = vrot.slane %v102_v49, 4  ;;  %v91_v53 = vrot.slane %v90_v47, 1 }
  0x95   :  { %v98_v54 = vadd.f32 %v97_v51, %v96_v48  ;;  %v104_v55 = vadd.f32 %v103_v52, %v102_v49  ;;  %v92_v59 = vadd.f32 %v91_v53, %v90_v47 }
  0x97   :  { %v99_v57 = vrot.slane %v98_v54, 1  ;;  %v105_v58 = vrot.slane %v104_v55, 2  ;;  %v114_v1 = vsel %vm113_vm1, %v92_v59, %v84_v62 }
  0x99   :  { %v106_v60 = vadd.f32 %v105_v58, %v104_v55  ;;  %v100_v61 = vadd.f32 %v99_v57, %v98_v54 }
  0x9b   :  { %v107_v63 = vrot.slane %v106_v60, 1  ;;  %v116_v2 = vsel %vm115_vm2, %v100_v61, %v114_v1 }
  0x9d   :  { %v108_v0 = vadd.f32 %v107_v63, %v106_v60 }
  0x9f   :  { %v118_v3 = vsel %vm117_vm3, %v108_v0, %v116_v2 }
  0xa0   :  { %120 = vst [vmem:[#allocation2] sm:$0xf] %v118_v3 }
  0xa1   :  { %150 = shalt.err (!%p147_p4)
}
  0xa2   :  { %s151_s16 = scalar_lea.hbm %s246_s2, 64 }
  0xa3   :  { %p152_p5 = scmp.ne.s32.totalorder %s246_s2, %s151_s16  ;;  %p155_p6 = scmp.lt.u32.totalorder %s151_s16, %s246_s2 }
  0xa5   :  { %p157_p7 = pnand %p155_p6, %p152_p5 }
  0xa7   :  { %160 = shalt.err (!%p157_p7)
}
  0xa8   :  { %130 = dma.vmem_to_hbm [thread:$0]  %s128_s12, 64, %s246_s2, [#allocation3]  }
  0xa9   :  { %161 = dma.done.wait [#allocation3], 64  }
  0xaa   :  { %162 = vsyncadd [#allocation3], 4294967232 }
  0xab   :  { %134 = vsyncpa [#allocation3], 1 }

</bundles_post_ra>
